<compile_context>
chip_gen: v7x
topology: tpu7x:2x2x1
jax: 0.10.0
libtpu: 0.0.40
codegen_flags: <defaults>
</compile_context>

<pallas_src>
import functools
import math

import jax
import jax.numpy as jnp
from jax.experimental import pallas as pl
from jax.experimental.pallas import tpu as pltpu


# ----------------------------------------------------------------------------
# helpers
# ----------------------------------------------------------------------------
def _pick_row_tile(m: int, cap: int = 256) -> int:
    """Largest row tile <= cap that divides m and is a multiple of 8 (or m itself)."""
    if m <= cap:
        return m
    t = (cap // 8) * 8
    while t >= 8:
        if m % t == 0:
            return t
        t -= 8
    return m


# ----------------------------------------------------------------------------
# Kernel 1: fused RMSNorm + projection matmul (row-tiled over tokens)
# ----------------------------------------------------------------------------
def _rmsnorm_matmul_kernel(x_ref, g_ref, w_ref, o_ref, *, eps):
    x = x_ref[...].astype(jnp.float32)                     # (tm, H)
    var = jnp.mean(x * x, axis=-1, keepdims=True)
    xn = x * jax.lax.rsqrt(var + eps)                      # RMS normalize in f32
    xn = xn * g_ref[...].astype(jnp.float32)               # RMSNorm weight
    o_ref[...] = jnp.dot(
        xn, w_ref[...].astype(jnp.float32),
        preferred_element_type=jnp.float32,
    ).astype(o_ref.dtype)


def rmsnorm_matmul(x2d, gamma, w, *, eps, row_tile):
    # TODO(synk): for production sizes (H>=4096, N>=11008) add N/K tiling with a
    # pl.when-guarded accumulator; full-K/full-N blocks are fine at these shapes.
    M, H = x2d.shape
    N = w.shape[1]
    tm = row_tile
    return pl.pallas_call(
        functools.partial(_rmsnorm_matmul_kernel, eps=eps),
        out_shape=jax.ShapeDtypeStruct((M, N), x2d.dtype),
        grid=(M // tm,),
        in_specs=[
            pl.BlockSpec((tm, H), lambda i: (i, 0)),
            pl.BlockSpec((1, H), lambda i: (0, 0)),
            pl.BlockSpec((H, N), lambda i: (0, 0)),
        ],
        out_specs=pl.BlockSpec((tm, N), lambda i: (i, 0)),
        compiler_params=pltpu.CompilerParams(
            dimension_semantics=("parallel",)),
    )(x2d, gamma.reshape(1, H), w)


# ----------------------------------------------------------------------------
# Kernel 2: attention with in-kernel RoPE (per batch, per head)
# ----------------------------------------------------------------------------
def _attention_kernel(inv_freq_ref, q_ref, k_ref, v_ref, o_ref, *, scale):
    S, D = q_ref.shape
    half = D // 2
    q = q_ref[...].astype(jnp.float32)                     # (S, D)
    k = k_ref[...].astype(jnp.float32)
    v = v_ref[...].astype(jnp.float32)

    # RoPE angles computed in-kernel (no HBM cos/sin table round trip);
    # cos/sin evaluated on the half-dim only -> half the EUP transcendentals.
    t = jax.lax.broadcasted_iota(jnp.float32, (S, half), 0)
    angles = t * inv_freq_ref[...]                         # (S, half)
    c = jnp.cos(angles)
    s = jnp.sin(angles)

    def rope(u):
        u1 = u[:, :half]
        u2 = u[:, half:]
        # equivalent to u*cat(c,c) + rotate_half(u)*cat(s,s)
        return jnp.concatenate([u1 * c - u2 * s, u2 * c + u1 * s], axis=-1)

    qr = rope(q)
    kr = rope(k)

    scores = jnp.dot(qr, kr.T, preferred_element_type=jnp.float32) * scale
    m = jnp.max(scores, axis=-1, keepdims=True)
    p = jnp.exp(scores - m)
    l = jnp.sum(p, axis=-1, keepdims=True)
    attn = p / l                                           # softmax in f32
    o_ref[...] = jnp.dot(attn, v, preferred_element_type=jnp.float32).astype(o_ref.dtype)


def attention(q, k, v, inv_freq, *, scale):
    # TODO(synk): flash-style KV tiling (online softmax) and additive attention_mask
    # support for long sequences; current kernel holds full (S, S) scores per head.
    B, NH, S, D = q.shape
    NKV = k.shape[1]
    groups = NH // NKV
    half = D // 2
    return pl.pallas_call(
        functools.partial(_attention_kernel, scale=scale),
        out_shape=jax.ShapeDtypeStruct((B, NH, S, D), q.dtype),
        grid=(B, NH),
        in_specs=[
            pl.BlockSpec((1, half), lambda b, h: (0, 0)),
            pl.BlockSpec((None, None, S, D), lambda b, h: (b, h, 0, 0)),
            pl.BlockSpec((None, None, S, D), lambda b, h: (b, h // groups, 0, 0)),
            pl.BlockSpec((None, None, S, D), lambda b, h: (b, h // groups, 0, 0)),
        ],
        out_specs=pl.BlockSpec((None, None, S, D), lambda b, h: (b, h, 0, 0)),
        compiler_params=pltpu.CompilerParams(
            dimension_semantics=("parallel", "parallel")),
    )(inv_freq.reshape(1, half).astype(jnp.float32), q, k, v)


# ----------------------------------------------------------------------------
# Kernel 3: o_proj matmul fused with residual add
# ----------------------------------------------------------------------------
def _matmul_residual_kernel(x_ref, w_ref, r_ref, o_ref):
    acc = jnp.dot(
        x_ref[...].astype(jnp.float32), w_ref[...].astype(jnp.float32),
        preferred_element_type=jnp.float32,
    )
    o_ref[...] = (r_ref[...].astype(jnp.float32) + acc).astype(o_ref.dtype)


def matmul_residual(x2d, w, resid, *, row_tile):
    M, K = x2d.shape
    N = w.shape[1]
    tm = row_tile
    return pl.pallas_call(
        _matmul_residual_kernel,
        out_shape=jax.ShapeDtypeStruct((M, N), resid.dtype),
        grid=(M // tm,),
        in_specs=[
            pl.BlockSpec((tm, K), lambda i: (i, 0)),
            pl.BlockSpec((K, N), lambda i: (0, 0)),
            pl.BlockSpec((tm, N), lambda i: (i, 0)),
        ],
        out_specs=pl.BlockSpec((tm, N), lambda i: (i, 0)),
        compiler_params=pltpu.CompilerParams(
            dimension_semantics=("parallel",)),
    )(x2d, w, resid)


# ----------------------------------------------------------------------------
# Kernel 4: SiLU(gate)*up fused with down_proj matmul + residual add
# ----------------------------------------------------------------------------
def _swiglu_down_residual_kernel(gate_ref, up_ref, w_ref, r_ref, o_ref):
    gate = gate_ref[...].astype(jnp.float32)
    up = up_ref[...].astype(jnp.float32)
    sig = 1.0 / (1.0 + jnp.exp(-gate))                     # sigmoid via EUP exp + reciprocal
    inter = gate * sig * up
    acc = jnp.dot(inter, w_ref[...].astype(jnp.float32),
                  preferred_element_type=jnp.float32)
    o_ref[...] = (r_ref[...].astype(jnp.float32) + acc).astype(o_ref.dtype)


def swiglu_down_residual(gate, up, w_down, resid, *, row_tile):
    M, I = gate.shape
    N = w_down.shape[1]
    tm = row_tile
    return pl.pallas_call(
        _swiglu_down_residual_kernel,
        out_shape=jax.ShapeDtypeStruct((M, N), resid.dtype),
        grid=(M // tm,),
        in_specs=[
            pl.BlockSpec((tm, I), lambda i: (i, 0)),
            pl.BlockSpec((tm, I), lambda i: (i, 0)),
            pl.BlockSpec((I, N), lambda i: (0, 0)),
            pl.BlockSpec((tm, N), lambda i: (i, 0)),
        ],
        out_specs=pl.BlockSpec((tm, N), lambda i: (i, 0)),
        compiler_params=pltpu.CompilerParams(
            dimension_semantics=("parallel",)),
    )(gate, up, w_down, resid)


# ----------------------------------------------------------------------------
# Decoder-layer wrapper
# ----------------------------------------------------------------------------
def llama_decoder_layer(x, params, *, num_heads, num_kv_heads,
                        eps=1e-6, rope_base=10000.0):
    B, S, H = x.shape
    head_dim = H // num_heads
    M = B * S
    tm = _pick_row_tile(M)

    x2d = x.reshape(M, H)

    # --- input RMSNorm fused with the (concatenated) QKV projection ---
    w_qkv = jnp.concatenate(
        [params["wq"].T, params["wk"].T, params["wv"].T], axis=1)  # (H, Hq+2*Hkv)
    qkv = rmsnorm_matmul(x2d, params["input_ln"], w_qkv, eps=eps, row_tile=tm)

    q_dim = num_heads * head_dim
    kv_dim = num_kv_heads * head_dim
    q = qkv[:, :q_dim].reshape(B, S, num_heads, head_dim).transpose(0, 2, 1, 3)
    k = qkv[:, q_dim:q_dim + kv_dim].reshape(B, S, num_kv_heads, head_dim).transpose(0, 2, 1, 3)
    v = qkv[:, q_dim + kv_dim:].reshape(B, S, num_kv_heads, head_dim).transpose(0, 2, 1, 3)

    # --- attention with in-kernel RoPE (GQA via index_map) ---
    inv_freq = 1.0 / (rope_base ** (jnp.arange(0, head_dim, 2, dtype=jnp.float32) / head_dim))
    attn = attention(q, k, v, inv_freq, scale=1.0 / math.sqrt(head_dim))  # (B, NH, S, hd)

    # --- o_proj + residual ---
    attn2d = attn.transpose(0, 2, 1, 3).reshape(M, H)
    h1 = matmul_residual(attn2d, params["wo"].T, x2d, row_tile=tm)

    # --- post-attention RMSNorm fused with gate/up projections ---
    w_gu = jnp.concatenate([params["wg"].T, params["wu"].T], axis=1)      # (H, 2I)
    gu = rmsnorm_matmul(h1, params["post_ln"], w_gu, eps=eps, row_tile=tm)
    inter_size = params["wg"].shape[0]

    # --- SwiGLU + down_proj + residual ---
    out2d = swiglu_down_residual(gu[:, :inter_size], gu[:, inter_size:],
                                 params["wd"].T, h1, row_tile=tm)
    return out2d.reshape(B, S, H)


# ----------------------------------------------------------------------------
# Pure-JAX reference (mirrors the PyTorch module, per-position RoPE)
# ----------------------------------------------------------------------------
def _reference_decoder(x, p, *, num_heads, num_kv_heads, eps, rope_base):
    B, S, H = x.shape
    hd = H // num_heads

    def rmsnorm(h, w):
        hf = h.astype(jnp.float32)
        var = jnp.mean(hf * hf, axis=-1, keepdims=True)
        hn = hf * jax.lax.rsqrt(var + eps)
        return (w * hn.astype(h.dtype)).astype(h.dtype)

    residual = x
    h = rmsnorm(x, p["input_ln"])
    q = h @ p["wq"].T
    k = h @ p["wk"].T
    v = h @ p["wv"].T
    q = q.reshape(B, S, num_heads, hd).transpose(0, 2, 1, 3)
    k = k.reshape(B, S, num_kv_heads, hd).transpose(0, 2, 1, 3)
    v = v.reshape(B, S, num_kv_heads, hd).transpose(0, 2, 1, 3)

    inv_freq = 1.0 / (rope_base ** (jnp.arange(0, hd, 2, dtype=jnp.float32) / hd))
    t = jnp.arange(S, dtype=jnp.float32)
    freqs = jnp.einsum("i,j->ij", t, inv_freq)
    emb = jnp.concatenate([freqs, freqs], axis=-1)
    cos = jnp.cos(emb)[None, None].astype(x.dtype)
    sin = jnp.sin(emb)[None, None].astype(x.dtype)

    def rot_half(u):
        return jnp.concatenate([-u[..., hd // 2:], u[..., :hd // 2]], axis=-1)

    q = q * cos + rot_half(q) * sin
    k = k * cos + rot_half(k) * sin

    groups = num_heads // num_kv_heads
    k = jnp.repeat(k, groups, axis=1)
    v = jnp.repeat(v, groups, axis=1)

    scores = jnp.einsum("bhqd,bhkd->bhqk", q, k) / math.sqrt(hd)
    w_ = jax.nn.softmax(scores.astype(jnp.float32), axis=-1).astype(x.dtype)
    attn = jnp.einsum("bhqk,bhkd->bhqd", w_, v)
    attn = attn.transpose(0, 2, 1, 3).reshape(B, S, H)
    attn = attn @ p["wo"].T
    h1 = residual + attn

    hn = rmsnorm(h1, p["post_ln"])
    gate = hn @ p["wg"].T
    up = hn @ p["wu"].T
    inter = jax.nn.silu(gate) * up
    return h1 + inter @ p["wd"].T


# ----------------------------------------------------------------------------
# main
# ----------------------------------------------------------------------------
if __name__ == "__main__":
    key = jax.random.PRNGKey(0)
    B, S, H = 2, 8, 32
    num_heads, num_kv_heads = 4, 2          # exercises GQA (groups = 2)
    head_dim = H // num_heads
    inter_size = 64
    eps = 1e-6
    rope_base = 10000.0

    ks = jax.random.split(key, 12)

    def wrand(k, shape, scale=0.2):
        return scale * jax.random.normal(k, shape, dtype=jnp.float32)

    x = jax.random.normal(ks[0], (B, S, H), dtype=jnp.float32)
    params = {
        "input_ln": 1.0 + 0.1 * jax.random.normal(ks[1], (H,), dtype=jnp.float32),
        "post_ln": 1.0 + 0.1 * jax.random.normal(ks[2], (H,), dtype=jnp.float32),
        "wq": wrand(ks[3], (num_heads * head_dim, H)),
        "wk": wrand(ks[4], (num_kv_heads * head_dim, H)),
        "wv": wrand(ks[5], (num_kv_heads * head_dim, H)),
        "wo": wrand(ks[6], (H, num_heads * head_dim)),
        "wg": wrand(ks[7], (inter_size, H)),
        "wu": wrand(ks[8], (inter_size, H)),
        "wd": wrand(ks[9], (H, inter_size)),
    }

    out = llama_decoder_layer(x, params, num_heads=num_heads,
                              num_kv_heads=num_kv_heads, eps=eps, rope_base=rope_base)
    out = jax.block_until_ready(out)

    ref = _reference_decoder(x, params, num_heads=num_heads,
                             num_kv_heads=num_kv_heads, eps=eps, rope_base=rope_base)

    assert out.shape == (B, S, H), out.shape
    assert out.dtype == x.dtype, out.dtype
    max_err = float(jnp.max(jnp.abs(out - ref)))
    assert jnp.allclose(out, ref, atol=1e-4, rtol=1e-4), f"max abs err {max_err}"

    print("KERNEL_OK")
</pallas_src>

<mosaic_0001>
module attributes {stable_mosaic.version = 11 : i64} {
  func.func @_rmsnorm_matmul_kernel(%arg0: i32, %arg1: memref<16x32xf32, #tpu.memory_space<vmem>>, %arg2: memref<1x32xf32, #tpu.memory_space<vmem>>, %arg3: memref<32x64xf32, #tpu.memory_space<vmem>>, %arg4: memref<16x64xf32, #tpu.memory_space<vmem>>) attributes {dimension_semantics = [#tpu.dimension_semantics<parallel>], iteration_bounds = array<i64: 1>, scalar_prefetch = 0 : i64, scratch_operands = 0 : i64, tpu.core_type = #tpu.core_type<tc>, window_params = [{transform_indices = @transform_0, window_bounds = array<i64: 16, 32>}, {pipeline_mode = #tpu.pipeline_mode<synchronous>, transform_indices = @transform_1, window_bounds = array<i64: 1, 32>}, {pipeline_mode = #tpu.pipeline_mode<synchronous>, transform_indices = @transform_2, window_bounds = array<i64: 32, 64>}, {transform_indices = @transform_3, window_bounds = array<i64: 16, 64>}]} {
    %c0 = arith.constant 0 : index
    %c0_0 = arith.constant 0 : index
    %0 = vector.load %arg1[%c0, %c0_0] : memref<16x32xf32, #tpu.memory_space<vmem>>, vector<16x32xf32>
    %1 = arith.mulf %0, %0 : vector<16x32xf32>
    %cst = arith.constant dense<0.000000e+00> : vector<16xf32>
    %2 = vector.multi_reduction <add>, %1, %cst [1] : vector<16x32xf32> to vector<16xf32>
    %3 = vector.shape_cast %2 : vector<16xf32> to vector<16x1xf32>
    %cst_1 = arith.constant 3.200000e+01 : f32
    %4 = vector.broadcast %cst_1 : f32 to vector<16x1xf32>
    %5 = arith.divf %3, %4 : vector<16x1xf32>
    %cst_2 = arith.constant 9.99999997E-7 : f32
    %6 = vector.broadcast %cst_2 : f32 to vector<16x1xf32>
    %7 = arith.addf %5, %6 : vector<16x1xf32>
    %8 = math.rsqrt %7 : vector<16x1xf32>
    %9 = vector.broadcast %8 : vector<16x1xf32> to vector<16x32xf32>
    %10 = arith.mulf %0, %9 : vector<16x32xf32>
    %c0_3 = arith.constant 0 : index
    %c0_4 = arith.constant 0 : index
    %11 = vector.load %arg2[%c0_3, %c0_4] : memref<1x32xf32, #tpu.memory_space<vmem>>, vector<1x32xf32>
    %12 = vector.broadcast %11 : vector<1x32xf32> to vector<16x32xf32>
    %13 = arith.mulf %10, %12 : vector<16x32xf32>
    %c0_5 = arith.constant 0 : index
    %c0_6 = arith.constant 0 : index
    %14 = vector.load %arg3[%c0_5, %c0_6] : memref<32x64xf32, #tpu.memory_space<vmem>>, vector<32x64xf32>
    %cst_7 = arith.constant dense<0.000000e+00> : vector<16x64xf32>
    %15 = tpu.matmul %13, %14, %cst_7 {dimension_numbers = #tpu.dot_dimension_numbers<[1], [0], [0], [1], [0, 0, 1, 1], [], []>} : vector<16x32xf32>, vector<32x64xf32>, vector<16x64xf32> -> vector<16x64xf32>
    %c0_8 = arith.constant 0 : index
    %c0_9 = arith.constant 0 : index
    %16 = vector.load %arg4[%c0_8, %c0_9] : memref<16x64xf32, #tpu.memory_space<vmem>>, vector<16x64xf32>
    tpu.vector_store %arg4[%c0_8, %c0_9], %15 {strides = array<i32>} : memref<16x64xf32, #tpu.memory_space<vmem>>, vector<16x64xf32>,
    return
  }
  func.func @transform_0(%arg0: i32) -> (i32, i32) {
    %c0_i32 = arith.constant 0 : i32
    %c0_i32_0 = arith.constant 0 : i32
    return %arg0, %c0_i32 : i32, i32
  }
  func.func @transform_1(%arg0: i32) -> (i32, i32) {
    %c0_i32 = arith.constant 0 : i32
    %c0_i32_0 = arith.constant 0 : i32
    %c0_i32_1 = arith.constant 0 : i32
    return %c0_i32, %c0_i32_0 : i32, i32
  }
  func.func @transform_2(%arg0: i32) -> (i32, i32) {
    %c0_i32 = arith.constant 0 : i32
    %c0_i32_0 = arith.constant 0 : i32
    %c0_i32_1 = arith.constant 0 : i32
    return %c0_i32, %c0_i32_0 : i32, i32
  }
  func.func @transform_3(%arg0: i32) -> (i32, i32) {
    %c0_i32 = arith.constant 0 : i32
    %c0_i32_0 = arith.constant 0 : i32
    return %arg0, %c0_i32 : i32, i32
  }
}

</mosaic_0001>

<bundles_post_ra>
// kernel: tpu_custom_call.1
= control target key start
LH: loop header
LB: loop body
LE: loop exit
PB: predicated region body
PF: predicated region fallthrough
CT: control target
= control target key end

     0   :  { %8 = vsyncpa [#allocation3], 0  ;;  %s364_s0 = inlined_call_operand.hbm [shape: f32[16,32], index: 0, kind: input, shape index: {}]   ;;  %s365_s1 = inlined_call_operand.vmem [shape: f32[1,32], index: 1, kind: input, shape index: {}]   ;;  %s366_s2 = inlined_call_operand.hbm [shape: f32[32,64], index: 2, kind: input, shape index: {}]   ;;  %s367_s3 = inlined_call_operand.hbm [shape: f32[16,64], index: 3, kind: output, shape index: {}]  }
   0x1   :  { %9 = vsyncpa [#allocation6], 0 }
   0x2   :  { %10 = vsyncpa [#allocation4], 0  ;;  %s287_s12 = smov [#allocation2]   ;;  %s215_s16 = scalar_lea.hbm %s364_s0, 256 }
   0x3   :  { %s16_s13 = sshll.u32 %s287_s12, 4  ;;  %p216_p0 = scmp.ne.s32.totalorder %s364_s0, %s215_s16  ;;  %s17_s13 = int_to_ptr.vmem [resolvable:$true] %s16_s13 }
   0x4   :  { %p219_p1 = scmp.lt.u32.totalorder %s215_s16, %s364_s0 }
   0x6   :  { %p221_p2 = pnand %p219_p1, %p216_p0 }
   0x8   :  { %224 = shalt.err (!%p221_p2)
}
   0x9   :  { %s225_s21 = scalar_lea.vmem %s17_s13, 256  ;;  %p230_p4 = scmp.lt.s32.totalorder %s17_s13, %s17_s13 }
   0xa   :  { %p226_p3 = scmp.ne.s32.totalorder %s17_s13, %s225_s21  ;;  %p231_p5 = scmp.lt.s32.totalorder %s225_s21, %s225_s21 }
   0xc   :  { %p232_p6 = por %p231_p5, %p230_p4 }
   0xe   :  { %p233_p7 = pnand %p232_p6, %p226_p3 }
  0x10   :  { %236 = shalt.err (!%p233_p7)
}
  0x11   :  { %s288_s22 = smov 128   ;;  %s289_s23 = smov 8  }
  0x12   :  { %22 = dma.hbm_to_vmem [thread:$0]  %s364_s0, 256, %s17_s13, [#allocation3], %s288_s22, %s288_s22, %s289_s23  }
  0x13   :  { %s290_s26 = smov [#allocation5]   ;;  %s237_s30 = scalar_lea.hbm %s366_s2, 512 }
  0x14   :  { %s30_s27 = sshll.u32 %s290_s26, 4  ;;  %p238_p8 = scmp.ne.s32.totalorder %s366_s2, %s237_s30  ;;  %s31_s27 = int_to_ptr.vmem [resolvable:$true] %s30_s27 }
  0x15   :  { %p241_p9 = scmp.lt.u32.totalorder %s237_s30, %s366_s2 }
  0x17   :  { %p243_p10 = pnand %p241_p9, %p238_p8 }
  0x19   :  { %246 = shalt.err (!%p243_p10)
}
  0x1a   :  { %s247_s8 = scalar_lea.vmem %s31_s27, 512  ;;  %p252_p12 = scmp.lt.s32.totalorder %s31_s27, %s31_s27 }
  0x1b   :  { %p248_p11 = scmp.ne.s32.totalorder %s31_s27, %s247_s8  ;;  %p253_p13 = scmp.lt.s32.totalorder %s247_s8, %s247_s8 }
  0x1d   :  { %p254_p0 = por %p253_p13, %p252_p12 }
  0x1f   :  { %p255_p1 = pnand %p254_p0, %p248_p11 }
  0x21   :  { %258 = shalt.err (!%p255_p1)
}
  0x22   :  { %36 = dma.hbm_to_vmem [thread:$0]  %s366_s2, 512, %s31_s27, [#allocation6], %s288_s22, %s288_s22, %s289_s23  }
  0x23   :  { %281 = dma.done.wait [#allocation3], 256  }
  0x24   :  { %282 = vsyncadd [#allocation3], 4294967040 }
  0x25   :  { %283 = dma.done.wait [#allocation6], 512  }
  0x26   :  { %284 = vsyncadd [#allocation6], 4294966784  ;;  %v43_v0 = vld [vmem:[#allocation2] sm:$0xff]  ;;  %vm47_vm0 = vcmask 261120   ;;  %v44_v1 = vld [vmem:[#allocation2 + $0x8] sm:$0xff]  ;;  %s291_s11 = smov [#allocation7]  }
  0x27   :  { %v45_v2 = vmul.f32 %v43_v0, %v43_v0  ;;  %v46_v3 = vmul.f32 %v44_v1, %v44_v1  ;;  %v72_v6 = vld [vmem:[#allocation5] sm:$0xff]  ;;  %v73_v7 = vld [vmem:[#allocation5 + $0x8] sm:$0xff]  ;;  %v74_v8 = vld [vmem:[#allocation5 + $0x10] sm:$0xff]  ;;  %s165_s12 = sshll.u32 %s291_s11, 4  ;;  %vm157_vm1 = vcmask 523264   ;;  %s166_s12 = int_to_ptr.vmem [resolvable:$true] %s165_s12 }
  0x28   :  { %v198_v9 = vpack.c.bf16 %v73_v7, %v72_v6  ;;  %v75_v10 = vld [vmem:[#allocation5 + $0x18] sm:$0xff]  ;;  %v178_v19 = vld [vmem:[%s365_s1] ss:$0 sm:$0xff]  ;;  %s259_s13 = scalar_lea.vmem %s166_s12, 256  ;;  %p264_p3 = scmp.lt.s32.totalorder %s166_s12, %s166_s12 }
  0x29   :  { %v48_v4 = vsel %vm47_vm0, %v45_v2, 0.0  ;;  %v51_v5 = vsel %vm47_vm0, %v46_v3, 0.0  ;;  %v202_v11 = vpack.c.bf16 %v75_v10, %v74_v8  ;;  %p260_p2 = scmp.ne.s32.totalorder %s166_s12, %s259_s13  ;;  %p265_p4 = scmp.lt.s32.totalorder %s259_s13, %s259_s13 }
  0x2a   :  { %49 = vadd.xlane.f32.xlu0 %v48_v4  ;;  %199 = vmatprep.subr.bf16.mxu0 %v198_v9 }
  0x2b   :  { %201 = vmatpush3.bf16.msra.mxu0 %v198_v9  ;;  %p266_p5 = por %p265_p4, %p264_p3 }
  0x2c   :  { %203 = vmatprep.subr.bf16.mxu0 %v202_v11 }
  0x2d   :  { %p267_p6 = pnand %p266_p5, %p260_p2 }
  0x2e   :  { %52 = vadd.xlane.f32.xlu0 %v51_v5 }
  0x2f   :  { %205 = vmatpush3.bf16.msra.mxu0 %v202_v11 }
  0xb7   :  { %v50_v12 = vpop.xlane.xlu0 %49 }
  0xb8   :  { %v55_v13 = vmul.f32 0.03125, %v50_v12 }
  0xba   :  { %v57_v14 = vadd.f32 1e-06, %v55_v13 }
  0xbb   :  { %v53_v15 = vpop.xlane.xlu0 %52 }
  0xbc   :  { %211 = vrsqrt.f32 %v57_v14  ;;  %v56_v16 = vmul.f32 0.03125, %v53_v15 }
  0xbe   :  { %v58_v17 = vadd.f32 1e-06, %v56_v16 }
  0xc0   :  { %213 = vrsqrt.f32 %v58_v17 }
  0xc6   :  { %v212_v18 = vpop.eup %211 }
  0xc7   :  { %v61_v20 = vmul.f32 %v212_v18, %v43_v0 }
  0xc9   :  { %v70_v21 = vmul.f32 %v178_v19, %v61_v20 }
  0xca   :  { %v214_v22 = vpop.eup %213 }
  0xcb   :  { %v62_v23 = vmul.f32 %v214_v22, %v44_v1  ;;  %195 = vmatprep.mubr.msk.f32.mxu0 %vm47_vm0, %v70_v21 }
  0xcd   :  { %v71_v24 = vmul.f32 %v178_v19, %v62_v23 }
  0xcf   :  { %196 = vmatmul.mubr.msk.f32.vlgmr.msra.gmra.mrb[0].mxu0 %vm47_vm0, %v71_v24 }
 0x1a2   :  { %v197_v25 = vpop.f32.mrb[0].mxu0 }
 0x1a3   :  { %159 = vst.msk [vmem:[#allocation7 + $0x8] sm:$0xff] %vm157_vm1, %v197_v25  ;;  %v148_v26 = vpop.f32.mrb[1].mxu0 }
 0x1a4   :  { %158 = vst.msk [vmem:[#allocation7] sm:$0xff] %vm157_vm1, %v148_v26 }
 0x1a5   :  { %270 = shalt.err (!%p267_p6)
}
 0x1a6   :  { %s271_s15 = scalar_lea.hbm %s367_s3, 256 }
 0x1a7   :  { %p272_p7 = scmp.ne.s32.totalorder %s367_s3, %s271_s15  ;;  %p275_p8 = scmp.lt.u32.totalorder %s271_s15, %s367_s3 }
 0x1a9   :  { %p277_p9 = pnand %p275_p8, %p272_p7 }
 0x1ab   :  { %280 = shalt.err (!%p277_p9)
}
 0x1ac   :  { %171 = dma.vmem_to_hbm [thread:$0]  %s166_s12, 256, %s367_s3, [#allocation4], %s288_s22, %s288_s22, %s289_s23  }
 0x1ad   :  { %285 = dma.done.wait [#allocation4], 256  }
 0x1ae   :  { %286 = vsyncadd [#allocation4], 4294967040 }
 0x1af   :  { %175 = vsyncpa [#allocation3], 1 }
 0x1b0   :  { %176 = vsyncpa [#allocation6], 1 }
 0x1b1   :  { %177 = vsyncpa [#allocation4], 1 }

</bundles_post_ra>
